<compile_context>
chip_gen: v5e
topology: v5e:2x2
jax: 0.10.0
libtpu: 0.0.40
codegen_flags: <defaults>
</compile_context>

<pallas_src>
import jax
import jax.numpy as jnp
from jax.experimental import pallas as pl
from jax.experimental.pallas import tpu as pltpu


# --------------------------------------------------------------------------
# Kernel: one lane-dense GEMM per batch tile.
# --------------------------------------------------------------------------
def _kernel(x_ref, w_ref, b_ref, o_ref):
    # x_ref: [TB, 513]  w_ref: [513, 128]  b_ref: [1, 128]  o_ref: [TB, 128]
    o_ref[...] = (
        jnp.dot(x_ref[...], w_ref[...], preferred_element_type=jnp.float32)
        + b_ref[...]
    ).astype(o_ref.dtype)


def _round_up(n, m):
    return ((n + m - 1) // m) * m


# --------------------------------------------------------------------------
# Wrapper: fold weights, tile the batch, call the kernel.
# --------------------------------------------------------------------------
def query_combined_features_forward(x, params, *, max_batch_tile=4096):
    """x: [B, 513] (f32 or bf16). params: dict of weights (see init_params)."""
    B, K = x.shape
    assert K == 513, "expected [hotrate(1) | query(256) | query_title(256)]"

    # ---- fold the all-linear network into a single [513,128] GEMM ----------
    w_hr_fc = params["w_hr"] @ params["wfc_hr"]                    # [16,128]
    w_folded = jnp.concatenate(
        [
            params["embed0"] @ w_hr_fc,                            # [1,128]
            params["w_q"] @ params["wfc_q"],                       # [256,128]
            params["w_qt"] @ params["wfc_qt"],                     # [256,128]
        ],
        axis=0,
    ).astype(x.dtype)                # bf16 x -> bf16 weights (MXU native path)
    b_folded = (
        params["b_hr"] @ params["wfc_hr"]
        + params["b_q"] @ params["wfc_q"]
        + params["b_qt"] @ params["wfc_qt"]
        + params["b_fc"]
    ).astype(jnp.float32)                                          # [1,128]

    # ---- batch tiling -------------------------------------------------------
    itemsize = jnp.dtype(x.dtype).itemsize
    sub = 8 * max(1, 4 // itemsize)          # f32 -> 8 sublanes, bf16 -> 16
    # Cap TB at ceil(B/4) so large-B runs always have >=4 grid steps
    # (both v7x TensorCores get work); keep TB a sublane multiple.
    TB = min(_round_up(max_batch_tile, sub), _round_up(pl.cdiv(B, 4), sub))
    grid = (pl.cdiv(B, TB),)                 # ragged last block: masked stores

    # ---- explicit VMEM budget: 2x x-tile (lane-padded) + 2x out + weights ---
    lane_k = _round_up(K, 128)                              # 513 -> 640 lanes
    x_tile_bytes = TB * lane_k * itemsize
    out_tile_bytes = TB * 128 * 4
    w_bytes = (K * 128) * jnp.dtype(w_folded.dtype).itemsize + 128 * 4
    vmem_limit = 2 * x_tile_bytes + 2 * out_tile_bytes + 2 * w_bytes + (8 << 20)
    vmem_limit = int(min(vmem_limit, 56 << 20))   # stay under v7x 64 MiB phys.

    out = pl.pallas_call(
        _kernel,
        out_shape=jax.ShapeDtypeStruct((B, 128), jnp.float32),
        grid_spec=pltpu.PrefetchScalarGridSpec(
            num_scalar_prefetch=0,
            grid=grid,
            in_specs=[
                # x: one batch tile per grid step (pipelined / double-buffered)
                pl.BlockSpec((TB, K), lambda i: (i, 0)),
                # folded weight + bias: constant block index -> resident
                pl.BlockSpec((K, 128), lambda i: (0, 0)),
                pl.BlockSpec((1, 128), lambda i: (0, 0)),
            ],
            out_specs=pl.BlockSpec((TB, 128), lambda i: (i, 0)),
        ),
        compiler_params=pltpu.CompilerParams(
            dimension_semantics=("parallel",),   # v7x: shard batch over 2 TCs
            vmem_limit_bytes=vmem_limit,
        ),
    )(x, w_folded, b_folded)

    return out


# --------------------------------------------------------------------------
# Deterministic parameter init mirroring the PyTorch module's shapes.
# --------------------------------------------------------------------------
def init_params(key, vocab_size=10, embed_dim=16,
                paragraph_in_dim=256, paragraph_out_dim=32):
    """Weights are stored pre-transposed as [in, out]."""
    initrange = 1.0 / 256
    ks = jax.random.split(key, 6)
    embed = jax.random.uniform(ks[0], (vocab_size, embed_dim),
                               minval=-initrange, maxval=initrange,
                               dtype=jnp.float32)
    w_hr = jax.random.uniform(ks[1], (16, 16), minval=-0.25, maxval=0.25,
                              dtype=jnp.float32)
    b_hr = jax.random.uniform(ks[2], (1, 16), minval=-0.25, maxval=0.25,
                              dtype=jnp.float32)
    w_q = jax.random.uniform(ks[3], (paragraph_in_dim, paragraph_out_dim),
                             minval=-initrange, maxval=initrange,
                             dtype=jnp.float32)
    w_qt = jax.random.uniform(ks[4], (paragraph_in_dim, paragraph_out_dim),
                              minval=-initrange, maxval=initrange,
                              dtype=jnp.float32)
    w_fc = jax.random.uniform(ks[5], (80, 128),
                              minval=-initrange, maxval=initrange,
                              dtype=jnp.float32)
    return {
        "embed0": embed[0:1, :],                     # [1,16]  embedding row 0
        "w_hr": w_hr, "b_hr": b_hr,
        "w_q": w_q, "b_q": jnp.zeros((1, 32), jnp.float32),
        "w_qt": w_qt, "b_qt": jnp.zeros((1, 32), jnp.float32),
        "wfc_hr": w_fc[0:16, :],                     # [16,128]
        "wfc_q": w_fc[16:48, :],                     # [32,128]
        "wfc_qt": w_fc[48:80, :],                    # [32,128]
        "b_fc": jnp.zeros((1, 128), jnp.float32),
    }


# --------------------------------------------------------------------------
# Pure-JAX reference implementing the ORIGINAL (unfolded) math.
# --------------------------------------------------------------------------
def _reference(x, p):
    hot = x[:, 0:1]
    q = x[:, 1:257]
    qt = x[:, 257:513]
    emb = p["embed0"] * hot
    hr_vec = emb @ p["w_hr"] + p["b_hr"]
    q_vec = q @ p["w_q"] + p["b_q"]
    qt_vec = qt @ p["w_qt"] + p["b_qt"]
    cat = jnp.concatenate([hr_vec, q_vec, qt_vec], axis=1)
    w_fc = jnp.concatenate([p["wfc_hr"], p["wfc_q"], p["wfc_qt"]], axis=0)
    return cat @ w_fc + p["b_fc"]


if __name__ == "__main__":
    key = jax.random.PRNGKey(0)
    k_x, k_p = jax.random.split(key)
    params = init_params(k_p)

    # Small test case (B=4): single grid step, block larger than the array
    # (masked store of the trailing rows).
    B = 4
    x = jax.random.normal(k_x, (B, 513), dtype=jnp.float32)
    out = jax.block_until_ready(query_combined_features_forward(x, params))
    ref = _reference(x, params)
    assert out.shape == (B, 128) and out.dtype == jnp.float32
    assert jnp.allclose(out, ref, atol=1e-5, rtol=1e-4)

    # B=20: non-divisible grid (3 steps of TB=8, ragged last block) with no
    # wrapper-side padding or output slice.
    x2 = jax.random.normal(jax.random.PRNGKey(1), (20, 513), dtype=jnp.float32)
    out2 = jax.block_until_ready(query_combined_features_forward(x2, params))
    ref2 = _reference(x2, params)
    assert out2.shape == (20, 128)
    assert jnp.allclose(out2, ref2, atol=1e-5, rtol=1e-4)

    print("KERNEL_OK")
</pallas_src>

<mosaic_0001>
module attributes {stable_mosaic.version = 11 : i64} {
  func.func @_kernel(%arg0: i32, %arg1: memref<8x513xf32, #tpu.memory_space<vmem>>, %arg2: memref<513x128xf32, #tpu.memory_space<vmem>>, %arg3: memref<1x128xf32, #tpu.memory_space<vmem>>, %arg4: memref<8x128xf32, #tpu.memory_space<vmem>>) attributes {dimension_semantics = [#tpu.dimension_semantics<parallel>], iteration_bounds = array<i64: 1>, scalar_prefetch = 0 : i64, scratch_operands = 0 : i64, tpu.core_type = #tpu.core_type<tc>, window_params = [{transform_indices = @transform_0, window_bounds = array<i64: 8, 513>}, {pipeline_mode = #tpu.pipeline_mode<synchronous>, transform_indices = @transform_1, window_bounds = array<i64: 513, 128>}, {pipeline_mode = #tpu.pipeline_mode<synchronous>, transform_indices = @transform_2, window_bounds = array<i64: 1, 128>}, {transform_indices = @transform_3, window_bounds = array<i64: 8, 128>}]} {
    %c0 = arith.constant 0 : index
    %c0_0 = arith.constant 0 : index
    %0 = vector.load %arg1[%c0, %c0_0] : memref<8x513xf32, #tpu.memory_space<vmem>>, vector<8x513xf32>
    %c0_1 = arith.constant 0 : index
    %c0_2 = arith.constant 0 : index
    %1 = vector.load %arg2[%c0_1, %c0_2] : memref<513x128xf32, #tpu.memory_space<vmem>>, vector<513x128xf32>
    %cst = arith.constant dense<0.000000e+00> : vector<8x128xf32>
    %2 = tpu.matmul %0, %1, %cst {dimension_numbers = #tpu.dot_dimension_numbers<[1], [0], [0], [1], [0, 0, 1, 1], [], []>} : vector<8x513xf32>, vector<513x128xf32>, vector<8x128xf32> -> vector<8x128xf32>
    %c0_3 = arith.constant 0 : index
    %c0_4 = arith.constant 0 : index
    %3 = vector.load %arg3[%c0_3, %c0_4] : memref<1x128xf32, #tpu.memory_space<vmem>>, vector<1x128xf32>
    %4 = vector.broadcast %3 : vector<1x128xf32> to vector<8x128xf32>
    %5 = arith.addf %2, %4 : vector<8x128xf32>
    %c0_5 = arith.constant 0 : index
    %c0_6 = arith.constant 0 : index
    %6 = vector.load %arg4[%c0_5, %c0_6] : memref<8x128xf32, #tpu.memory_space<vmem>>, vector<8x128xf32>
    tpu.vector_store %arg4[%c0_5, %c0_6], %5 {strides = array<i32>} : memref<8x128xf32, #tpu.memory_space<vmem>>, vector<8x128xf32>,
    return
  }
  func.func @transform_0(%arg0: i32) -> (i32, i32) {
    %c0_i32 = arith.constant 0 : i32
    %c0_i32_0 = arith.constant 0 : i32
    return %arg0, %c0_i32 : i32, i32
  }
  func.func @transform_1(%arg0: i32) -> (i32, i32) {
    %c0_i32 = arith.constant 0 : i32
    %c0_i32_0 = arith.constant 0 : i32
    %c0_i32_1 = arith.constant 0 : i32
    return %c0_i32, %c0_i32_0 : i32, i32
  }
  func.func @transform_2(%arg0: i32) -> (i32, i32) {
    %c0_i32 = arith.constant 0 : i32
    %c0_i32_0 = arith.constant 0 : i32
    %c0_i32_1 = arith.constant 0 : i32
    return %c0_i32, %c0_i32_0 : i32, i32
  }
  func.func @transform_3(%arg0: i32) -> (i32, i32) {
    %c0_i32 = arith.constant 0 : i32
    %c0_i32_0 = arith.constant 0 : i32
    return %arg0, %c0_i32 : i32, i32
  }
}

</mosaic_0001>

<bundles_post_ra>
// kernel: tpu_custom_call.1
= control target key start
LH: loop header
LB: loop body
LE: loop exit
PB: predicated region body
PF: predicated region fallthrough
CT: control target
= control target key end

     0   :  { %8 = vsyncpa [#allocation3], 0  ;;  %s407_s0 = inlined_call_operand.hbm [shape: f32[4,513], index: 0, kind: input, shape index: {}]   ;;  %s408_s1 = inlined_call_operand.hbm [shape: f32[513,128], index: 1, kind: input, shape index: {}]   ;;  %s409_s2 = inlined_call_operand.vmem [shape: f32[1,128], index: 2, kind: input, shape index: {}]   ;;  %s410_s3 = inlined_call_operand.hbm [shape: f32[4,128], index: 3, kind: output, shape index: {}]  }
   0x1   :  { %9 = vsyncpa [#allocation6], 0 }
   0x2   :  { %10 = vsyncpa [#allocation4], 0 }
   0x3   :  { %14 = vsyncadd [#allocation3], 320  ;;  %s15_s14 = sshll.u32 %s407_s0, 4  ;;  %s366_s15 = smov [#allocation2]   ;;  %s16_s14 = int_to_ptr.hbm [resolvable:$true] %s15_s14 }
   0x4   :  { %s17_s16 = sshll.u32 %s366_s15, 4  ;;  %s28_s19 = sshll.u32 %s408_s1, 4  ;;  %s18_s16 = int_to_ptr.vmem [resolvable:$true] %s17_s16  ;;  %s29_s19 = int_to_ptr.hbm [resolvable:$true] %s28_s19 }
   0x5   :  { %s367_s20 = smov 320   ;;  %s368_s21 = smov 20  }
   0x6   :  { %23 = dma.hbm_to_vmem [thread:$0]  %s16_s14, 320, %s18_s16, [#allocation3], %s367_s20, %s367_s20, %s368_s21  }
   0x7   :  { %s369_s22 = smov [#allocation5]   ;;  %s370_s24 = smov 128  }
   0x8   :  { %s30_s23 = sshll.u32 %s369_s22, 4  ;;  %s371_s25 = smov 8   ;;  %s31_s23 = int_to_ptr.vmem [resolvable:$true] %s30_s23 }
   0x9   :  { %36 = dma.hbm_to_vmem [thread:$0]  %s29_s19, 8320, %s31_s23, [#allocation6], %s370_s24, %s370_s24, %s371_s25  }
   0xa   :  { %360 = dma.done.wait [#allocation3], 640  }
   0xb   :  { %361 = vsyncadd [#allocation3], 4294966656 }
   0xc   :  { %362 = dma.done.wait [#allocation6], 8320  }
   0xd   :  { %363 = vsyncadd [#allocation6], 4294958976  ;;  %v100_v0 = vld [vmem:[#allocation5 + $0x178] sm:$0xff]  ;;  %v99_v2 = vld [vmem:[#allocation5 + $0x170] sm:$0xff]  ;;  %vm151_vm0 = vcmask 1040384   ;;  %vm148_vm1 = vcmask 7168  }
   0xe   :  { %v68_v1 = vld [vmem:[#allocation5 + $0x78] sm:$0xff]  ;;  %195 = vmatpush.msra.mxu2 %v100_v0  ;;  %v67_v4 = vld [vmem:[#allocation5 + $0x70] sm:$0xff]  ;;  %v98_v6 = vld [vmem:[#allocation5 + $0x168] sm:$0xff] }
   0xf   :  { %155 = vmatpush.msra.mxu0 %v68_v1  ;;  %v116_v3 = vld [vmem:[#allocation5 + $0x1f8] sm:$0xff]  ;;  %v115_v7 = vld [vmem:[#allocation5 + $0x1f0] sm:$0xff]  ;;  %v66_v8 = vld [vmem:[#allocation5 + $0x68] sm:$0xff] }
  0x10   :  { %v84_v5 = vld [vmem:[#allocation5 + $0xf8] sm:$0xff]  ;;  %215 = vmatpush.msra.mxu3 %v116_v3  ;;  %196 = vmatpush.msra.mxu2 %v99_v2  ;;  %v83_v9 = vld [vmem:[#allocation5 + $0xf0] sm:$0xff]  ;;  %v114_v10 = vld [vmem:[#allocation5 + $0x1e8] sm:$0xff] }
  0x11   :  { %175 = vmatpush.msra.mxu1 %v84_v5  ;;  %156 = vmatpush.msra.mxu0 %v67_v4  ;;  %v97_v11 = vld [vmem:[#allocation5 + $0x160] sm:$0xff]  ;;  %v82_v13 = vld [vmem:[#allocation5 + $0xe8] sm:$0xff]  ;;  %v96_v16 = vld [vmem:[#allocation5 + $0x158] sm:$0xff] }
  0x12   :  { %216 = vmatpush.msra.mxu3 %v115_v7  ;;  %v65_v12 = vld [vmem:[#allocation5 + $0x60] sm:$0xff]  ;;  %197 = vmatpush.msra.mxu2 %v98_v6  ;;  %v64_v17 = vld [vmem:[#allocation5 + $0x58] sm:$0xff]  ;;  %v95_v20 = vld [vmem:[#allocation5 + $0x150] sm:$0xff] }
  0x13   :  { %176 = vmatpush.msra.mxu1 %v83_v9  ;;  %157 = vmatpush.msra.mxu0 %v66_v8  ;;  %v113_v14 = vld [vmem:[#allocation5 + $0x1e0] sm:$0xff]  ;;  %v112_v18 = vld [vmem:[#allocation5 + $0x1d8] sm:$0xff]  ;;  %v63_v21 = vld [vmem:[#allocation5 + $0x50] sm:$0xff] }
  0x14   :  { %v81_v15 = vld [vmem:[#allocation5 + $0xe0] sm:$0xff]  ;;  %217 = vmatpush.msra.mxu3 %v114_v10  ;;  %198 = vmatpush.msra.mxu2 %v97_v11  ;;  %v80_v19 = vld [vmem:[#allocation5 + $0xd8] sm:$0xff]  ;;  %v111_v22 = vld [vmem:[#allocation5 + $0x1d0] sm:$0xff] }
  0x15   :  { %177 = vmatpush.msra.mxu1 %v82_v13  ;;  %158 = vmatpush.msra.mxu0 %v65_v12  ;;  %v79_v23 = vld [vmem:[#allocation5 + $0xd0] sm:$0xff]  ;;  %v94_v24 = vld [vmem:[#allocation5 + $0x148] sm:$0xff]  ;;  %v93_v28 = vld [vmem:[#allocation5 + $0x140] sm:$0xff] }
  0x16   :  { %218 = vmatpush.msra.mxu3 %v113_v14  ;;  %199 = vmatpush.msra.mxu2 %v96_v16  ;;  %v62_v25 = vld [vmem:[#allocation5 + $0x48] sm:$0xff]  ;;  %v61_v29 = vld [vmem:[#allocation5 + $0x40] sm:$0xff]  ;;  %v92_v32 = vld [vmem:[#allocation5 + $0x138] sm:$0xff] }
  0x17   :  { %178 = vmatpush.msra.mxu1 %v81_v15  ;;  %159 = vmatpush.msra.mxu0 %v64_v17  ;;  %v110_v26 = vld [vmem:[#allocation5 + $0x1c8] sm:$0xff]  ;;  %v109_v30 = vld [vmem:[#allocation5 + $0x1c0] sm:$0xff]  ;;  %v60_v33 = vld [vmem:[#allocation5 + $0x38] sm:$0xff] }
  0x18   :  { %219 = vmatpush.msra.mxu3 %v112_v18  ;;  %200 = vmatpush.msra.mxu2 %v95_v20  ;;  %v78_v27 = vld [vmem:[#allocation5 + $0xc8] sm:$0xff]  ;;  %v77_v31 = vld [vmem:[#allocation5 + $0xc0] sm:$0xff]  ;;  %v108_v34 = vld [vmem:[#allocation5 + $0x1b8] sm:$0xff] }
  0x19   :  { %179 = vmatpush.msra.mxu1 %v80_v19  ;;  %160 = vmatpush.msra.mxu0 %v63_v21  ;;  %v76_v35 = vld [vmem:[#allocation5 + $0xb8] sm:$0xff]  ;;  %v91_v36 = vld [vmem:[#allocation5 + $0x130] sm:$0xff]  ;;  %v90_v40 = vld [vmem:[#allocation5 + $0x128] sm:$0xff] }
  0x1a   :  { %220 = vmatpush.msra.mxu3 %v111_v22  ;;  %201 = vmatpush.msra.mxu2 %v94_v24  ;;  %v59_v37 = vld [vmem:[#allocation5 + $0x30] sm:$0xff]  ;;  %v58_v41 = vld [vmem:[#allocation5 + $0x28] sm:$0xff]  ;;  %v89_v42 = vld [vmem:[#allocation5 + $0x120] sm:$0xff] }
  0x1b   :  { %180 = vmatpush.msra.mxu1 %v79_v23  ;;  %161 = vmatpush.msra.mxu0 %v62_v25  ;;  %v107_v38 = vld [vmem:[#allocation5 + $0x1b0] sm:$0xff]  ;;  %v106_v43 = vld [vmem:[#allocation5 + $0x1a8] sm:$0xff]  ;;  %v57_v44 = vld [vmem:[#allocation5 + $0x20] sm:$0xff] }
  0x1c   :  { %221 = vmatpush.msra.mxu3 %v110_v26  ;;  %202 = vmatpush.msra.mxu2 %v93_v28  ;;  %v75_v39 = vld [vmem:[#allocation5 + $0xb0] sm:$0xff]  ;;  %v74_v45 = vld [vmem:[#allocation5 + $0xa8] sm:$0xff]  ;;  %v88_v46 = vld [vmem:[#allocation5 + $0x118] sm:$0xff] }
  0x1d   :  { %181 = vmatpush.msra.mxu1 %v78_v27  ;;  %162 = vmatpush.msra.mxu0 %v61_v29  ;;  %v105_v47 = vld [vmem:[#allocation5 + $0x1a0] sm:$0xff]  ;;  %v51_v49 = vld [vmem:[#allocation2 + $0x1c] sm:$0xff]  ;;  %v50_v55 = vld [vmem:[#allocation2 + $0x14] sm:$0xff] }
  0x1e   :  { %222 = vmatpush.msra.mxu3 %v109_v30  ;;  %203 = vmatpush.msra.mxu2 %v92_v32  ;;  %v48_v48 = vld [vmem:[#allocation2 + $0x8] sm:$0xff]  ;;  %v56_v50 = vld [vmem:[#allocation5 + $0x18] sm:$0xff]  ;;  %134 = vst [vmem:[#allocation1 + $0x11] ss:$2 sm:$0xff] %v51_v49  ;;  %v49_v56 = vld [vmem:[#allocation2 + $0x10] sm:$0xf] }
  0x1f   :  { %182 = vmatpush.msra.mxu1 %v77_v31  ;;  %163 = vmatpush.msra.mxu0 %v60_v33  ;;  %v73_v51 = vld [vmem:[#allocation5 + $0xa0] sm:$0xff]  ;;  %132 = vst [vmem:[#allocation1 + $0x10] ss:$2 sm:$0xff] %v48_v48  ;;  %v47_v52 = vld [vmem:[#allocation2] sm:$0xff]  ;;  %v87_v58 = vld [vmem:[#allocation5 + $0x110] sm:$0xff] }
  0x20   :  { %223 = vmatpush.msra.mxu3 %v108_v34  ;;  %204 = vmatpush.msra.mxu2 %v91_v36  ;;  %v104_v53 = vld [vmem:[#allocation5 + $0x198] sm:$0xff]  ;;  %128 = vst [vmem:[#allocation1] ss:$2 sm:$0xff] %v47_v52  ;;  %v55_v59 = vld [vmem:[#allocation5 + $0x10] sm:$0xff]  ;;  %v86_v62 = vld [vmem:[#allocation5 + $0x108] sm:$0xff] }
  0x21   :  { %183 = vmatpush.msra.mxu1 %v76_v35  ;;  %164 = vmatpush.msra.mxu0 %v59_v37  ;;  %v72_v54 = vld [vmem:[#allocation5 + $0x98] sm:$0xff]  ;;  %130 = vst [vmem:[#allocation1 + $0x1] ss:$2 sm:$0xff] %v50_v55  ;;  %v103_v60 = vld [vmem:[#allocation5 + $0x190] sm:$0xff]  ;;  %v54_v63 = vld [vmem:[#allocation5 + $0x8] sm:$0xff] }
  0x22   :  { %224 = vmatpush.msra.mxu3 %v107_v38  ;;  %205 = vmatpush.msra.mxu2 %v90_v40  ;;  %v52_v57 = vld [vmem:[#allocation2 + $0x24] sm:$0xf]  ;;  %v71_v61 = vld [vmem:[#allocation5 + $0x90] sm:$0xff]  ;;  %136 = vst [vmem:[#allocation1 + $0x20] ss:$2 sm:$0xff] %v49_v56  ;;  %v102_v0 = vld [vmem:[#allocation5 + $0x188] sm:$0xff] }
  0x23   :  { %184 = vmatpush.msra.mxu1 %v75_v39  ;;  %165 = vmatpush.msra.mxu0 %v58_v41  ;;  %138 = vst [vmem:[#allocation1 + $0x21] ss:$2 sm:$0xff] %v52_v57  ;;  %v70_v1 = vld [vmem:[#allocation5 + $0x88] sm:$0xff]  ;;  %v85_v2 = vld [vmem:[#allocation5 + $0x100] sm:$0xff]  ;;  %v287_v12 = vld [vmem:[%s409_s2] ss:$0 sm:$0xff] }
  0x24   :  { %225 = vmatpush.msra.mxu3 %v106_v43  ;;  %206 = vmatpush.msra.mxu2 %v89_v42  ;;  %v53_v3 = vld [vmem:[#allocation5] sm:$0xff] }
  0x25   :  { %185 = vmatpush.msra.mxu1 %v74_v45  ;;  %166 = vmatpush.msra.mxu0 %v57_v44  ;;  %v101_v5 = vld [vmem:[#allocation5 + $0x180] sm:$0xff] }
  0x26   :  { %226 = vmatpush.msra.mxu3 %v105_v47  ;;  %207 = vmatpush.msra.mxu2 %v88_v46  ;;  %v141_v4 = vld.sshfl [vmem:[#allocation1 + $0x10] sm:$0xff pattern:$0x75316420]  ;;  %v142_v6 = vld.sshfl [vmem:[#allocation1 + $0x18] sm:$0xff pattern:$0x75316420] }
  0x27   :  { %186 = vmatpush.msra.mxu1 %v73_v51  ;;  %167 = vmatpush.msra.mxu0 %v56_v50  ;;  %v117_v8 = vld [vmem:[#allocation5 + $0x200] sm:$0x1] }
  0x28   :  { %227 = vmatpush.msra.mxu3 %v104_v53  ;;  %208 = vmatpush.msra.mxu2 %v87_v58  ;;  %v139_v7 = vld.sshfl [vmem:[#allocation1] sm:$0xff pattern:$0x75316420]  ;;  %v69_v9 = vld [vmem:[#allocation5 + $0x80] sm:$0xff] }
  0x29   :  { %187 = vmatpush.msra.mxu1 %v72_v54  ;;  %168 = vmatpush.msra.mxu0 %v55_v59  ;;  %v140_v10 = vld.sshfl [vmem:[#allocation1 + $0x8] sm:$0xff pattern:$0x75316420] }
  0x2a   :  { %228 = vmatpush.msra.mxu3 %v103_v60  ;;  %209 = vmatpush.msra.mxu2 %v86_v62  ;;  %v143_v11 = vld.sshfl [vmem:[#allocation1 + $0x20] sm:$0xff pattern:$0x75316420] }
  0x2b   :  { %188 = vmatpush.msra.mxu1 %v71_v61  ;;  %169 = vmatpush.msra.mxu0 %v54_v63 }
  0x2c   :  { %229 = vmatpush.msra.mxu3 %v102_v0  ;;  %210 = vmatpush.msra.mxu2 %v85_v2 }
  0x2d   :  { %189 = vmatpush.msra.mxu1 %v70_v1  ;;  %170 = vmatpush.msra.mxu0 %v53_v3 }
  0x2e   :  { %211 = vmatmul.f32.vlgmr.msra.gmra.mxu2 %v141_v4  ;;  %230 = vmatpush.msra.mxu3 %v101_v5 }
  0x2f   :  { %171 = vmatmul.f32.vlgmr.msra.gmra.mxu0 %v139_v7  ;;  %231 = vmatmul.f32.vlgmr.msra.gmra.mxu3 %v142_v6 }
  0x30   :  { %276 = vmatpush.msk.msrb.mxu0 %vm151_vm0, %v117_v8  ;;  %190 = vmatpush.msra.mxu1 %v69_v9 }
  0x31   :  { %191 = vmatmul.f32.vlgmr.msra.gmra.mxu1 %v140_v10 }
  0x37   :  { %277 = vmatmul.msk.f32.vlgmr.msrb.gmra.mxu0 %vm148_vm1, %v143_v11 }
  0xac   :  { %v172_v13 = vpop.f32.mrf.mxu0 }
  0xad   :  { %v173_v14 = vadd.f32 %v287_v12, %v172_v13 }
  0xae   :  { %v192_v15 = vpop.f32.mrf.mxu1 }
  0xaf   :  { %v193_v16 = vadd.f32 %v192_v15, %v173_v14 }
  0xb1   :  { %v212_v17 = vpop.f32.mrf.mxu2 }
  0xb2   :  { %v213_v18 = vadd.f32 %v212_v17, %v193_v16  ;;  %v232_v19 = vpop.f32.mrf.mxu3 }
  0xb4   :  { %v233_v20 = vadd.f32 %v232_v19, %v213_v18  ;;  %v252_v21 = vpop.f32.mrf.mxu0 }
  0xb6   :  { %v253_v22 = vadd.f32 %v252_v21, %v233_v20 }
  0xb8   :  { %255 = vst [vmem:[#allocation7] sm:$0xff] %v253_v22 }
  0xb9   :  { %259 = vsyncadd [#allocation4], 64  ;;  %s262_s28 = sshll.u32 %s410_s3, 4  ;;  %s372_s29 = smov [#allocation7]   ;;  %s263_s28 = int_to_ptr.hbm [resolvable:$true] %s262_s28 }
  0xba   :  { %s260_s30 = sshll.u32 %s372_s29, 4  ;;  %s373_s2 = smov 64   ;;  %s261_s30 = int_to_ptr.vmem [resolvable:$true] %s260_s30 }
  0xbb   :  { %s374_s4 = smov 4  }
  0xbc   :  { %268 = dma.vmem_to_hbm [thread:$0]  %s261_s30, 64, %s263_s28, [#allocation4], %s373_s2, %s373_s2, %s374_s4  }
  0xbd   :  { %364 = dma.done.wait [#allocation4], 128  }
  0xbe   :  { %365 = vsyncadd [#allocation4], 4294967168 }
  0xbf   :  { %273 = vsyncpa [#allocation3], 1 }
  0xc0   :  { %274 = vsyncpa [#allocation6], 1 }
  0xc1   :  { %275 = vsyncpa [#allocation4], 1 }

</bundles_post_ra>
